<compile_context>
chip_gen: v7x
topology: tpu7x:2x2x1
jax: 0.10.0
libtpu: 0.0.40
codegen_flags: <defaults>
</compile_context>

<pallas_src>
import functools
import math

import jax
import jax.numpy as jnp
from jax.experimental import pallas as pl
from jax.experimental.pallas import tpu as pltpu


# Explicit scoped-VMEM limit: v5e default is 16 MiB, v6e 32 MiB; v7x has only
# 64 MiB physical, so 48 MiB is a safe explicit value on every generation.
_VMEM_LIMIT = 48 * 1024 * 1024


# ----------------------------- tiling helpers --------------------------------

def _round_up(x, m):
    return ((x + m - 1) // m) * m


def _pick_tile(dim, target, base):
    """Largest multiple of `base` that divides `dim` and is <= target, else full dim."""
    if dim <= target:
        return dim
    t = (min(target, dim) // base) * base
    while t >= base:
        if dim % t == 0:
            return t
        t -= base
    return dim


def _choose_m_tile(m, target, base=16):
    """Tile the M (= N*S) axis.  Prefer a divisor; otherwise cap the tile at
    `target` and pad M up to a multiple (no full-M fallback -> no VMEM blowup)."""
    t = _pick_tile(m, target, base)
    if t <= target:
        return t, m
    return target, _round_up(m, target)


def _pad_rows(x, m_pad):
    m = x.shape[0]
    if m == m_pad:
        return x
    pad = [(0, m_pad - m)] + [(0, 0)] * (x.ndim - 1)
    return jnp.pad(x, pad)


@functools.lru_cache(maxsize=1)
def _has_bf16_eup():
    """bf16 exp is only a win on chips with a bf16 EUP (v6e / v7x); v5e has none."""
    try:
        kind = jax.devices()[0].device_kind.lower()
    except Exception:
        return False
    return ("v6" in kind) or ("v7" in kind)


# ------------------------ generic tiled matmul + bias ------------------------

def _matmul_bias_kernel(x_ref, w_ref, b_ref, o_ref, acc_ref, *, activation):
    k = pl.program_id(2)

    @pl.when(k == 0)
    def _():
        acc_ref[...] = jnp.zeros_like(acc_ref)

    acc_ref[...] += jnp.dot(x_ref[...], w_ref[...],
                            preferred_element_type=jnp.float32)

    @pl.when(k == pl.num_programs(2) - 1)
    def _():
        y = acc_ref[...] + b_ref[...].astype(jnp.float32)
        if activation == "relu":
            y = jnp.maximum(y, 0.0)
        o_ref[...] = y.astype(o_ref.dtype)


def matmul_bias(x, w, b, *, activation="none", out_dtype=jnp.bfloat16,
                tm=512, tn=512, tk=512):
    m, kd = x.shape
    n = w.shape[1]
    tm, m_pad = _choose_m_tile(m, tm)
    tn = _pick_tile(n, tn, 128)
    tk = _pick_tile(kd, tk, 128)
    x_p = _pad_rows(x, m_pad)
    grid = (m_pad // tm, n // tn, kd // tk)
    out = pl.pallas_call(
        functools.partial(_matmul_bias_kernel, activation=activation),
        out_shape=jax.ShapeDtypeStruct((m_pad, n), out_dtype),
        grid=grid,
        in_specs=[
            pl.BlockSpec((tm, tk), lambda i, j, k: (i, k)),
            pl.BlockSpec((tk, tn), lambda i, j, k: (k, j)),
            pl.BlockSpec((1, tn), lambda i, j, k: (0, j)),
        ],
        out_specs=pl.BlockSpec((tm, tn), lambda i, j, k: (i, j)),
        scratch_shapes=[pltpu.VMEM((tm, tn), jnp.float32)],
        compiler_params=pltpu.CompilerParams(
            dimension_semantics=("parallel", "parallel", "arbitrary"),
            vmem_limit_bytes=_VMEM_LIMIT),
    )(x_p, w, b.reshape(1, n))
    return out[:m] if m_pad != m else out


# --------------- QKV projection -> head-major (3, H, M, dh) output ------------

def _qkv_proj_kernel(x_ref, w_ref, b_ref, o_ref, acc_ref, *, n_heads):
    k = pl.program_id(2)

    @pl.when(k == 0)
    def _():
        acc_ref[...] = jnp.zeros_like(acc_ref)

    # full-width (tm, D) contraction keeps the MXU fully utilized
    acc_ref[...] += jnp.dot(x_ref[...], w_ref[0],
                            preferred_element_type=jnp.float32)

    @pl.when(k == pl.num_programs(2) - 1)
    def _():
        y = acc_ref[...] + b_ref[0].astype(jnp.float32)      # (tm, D)
        dh = o_ref.shape[-1]
        # split heads onto the leading axis only in the epilogue (once per tile),
        # so the attention inner loop never needs lane-offset slices.
        for h in range(n_heads):
            o_ref[0, h] = y[:, h * dh:(h + 1) * dh].astype(o_ref.dtype)


def qkv_projection(x, w3, b3, *, n_heads, out_dtype=jnp.bfloat16, tm=512, tk=512):
    """x:[M,D], w3:[3,D,D], b3:[3,D]  ->  [3, H, M, dh] (head-major q/k/v)."""
    m, d = x.shape
    dh = d // n_heads
    tm, m_pad = _choose_m_tile(m, tm)
    tk = _pick_tile(d, tk, 128)
    x_p = _pad_rows(x, m_pad)
    grid = (m_pad // tm, 3, d // tk)
    out = pl.pallas_call(
        functools.partial(_qkv_proj_kernel, n_heads=n_heads),
        out_shape=jax.ShapeDtypeStruct((3, n_heads, m_pad, dh), out_dtype),
        grid=grid,
        in_specs=[
            pl.BlockSpec((tm, tk), lambda i, j, k: (i, k)),
            pl.BlockSpec((1, tk, d), lambda i, j, k: (j, k, 0)),
            pl.BlockSpec((1, 1, d), lambda i, j, k: (j, 0, 0)),
        ],
        out_specs=pl.BlockSpec((1, n_heads, tm, dh), lambda i, j, k: (j, 0, i, 0)),
        scratch_shapes=[pltpu.VMEM((tm, d), jnp.float32)],
        compiler_params=pltpu.CompilerParams(
            dimension_semantics=("parallel", "parallel", "arbitrary"),
            vmem_limit_bytes=_VMEM_LIMIT),
    )(x_p, w3, b3.reshape(3, 1, d))
    if m_pad != m:
        out = out[:, :, :m, :]
    return out


# ---- flash attention + fused out-projection + residual + LayerNorm ----------

def _attention_kernel(q_ref, k_ref, v_ref, bias_ref, wo_ref, bo_ref, res_ref,
                      g_ref, be_ref, o_ref, m_sc, l_sc, acc_sc,
                      *, n_heads, exp_dtype, eps):
    kv = pl.program_id(2)

    @pl.when(kv == 0)
    def _():
        m_sc[...] = jnp.full_like(m_sc, -jnp.inf)
        l_sc[...] = jnp.zeros_like(l_sc)
        acc_sc[...] = jnp.zeros_like(acc_sc)

    bias = bias_ref[0]                                       # (1, tkv) f32

    for h in range(n_heads):
        qh = q_ref[h, 0]                                     # (tq, dh)  full tile
        kh = k_ref[h, 0]                                     # (tkv, dh) full tile
        vh = v_ref[h, 0]                                     # (tkv, dh) full tile
        # 1/sqrt(dh) is folded into Wq, so no per-score scale multiply here.
        s = jax.lax.dot_general(qh, kh, (((1,), (1,)), ((), ())),
                                preferred_element_type=jnp.float32)
        s = s + bias                                         # key-padding bias
        m_prev = m_sc[h]                                     # (tq, 1)
        m_new = jnp.maximum(m_prev, jnp.max(s, axis=-1, keepdims=True))
        alpha = jnp.exp(m_prev - m_new)
        # bf16 exp on v6e/v7x (EUP is the likely binding slot); f32 on v5e.
        p = jnp.exp((s - m_new).astype(exp_dtype))
        l_sc[h] = alpha * l_sc[h] + jnp.sum(p.astype(jnp.float32),
                                            axis=-1, keepdims=True)
        pv = jax.lax.dot_general(p.astype(vh.dtype), vh,
                                 (((1,), (0,)), ((), ())),
                                 preferred_element_type=jnp.float32)
        acc_sc[h] = alpha * acc_sc[h] + pv                   # full-tile RMW
        m_sc[h] = m_new

    @pl.when(kv == pl.num_programs(2) - 1)
    def _():
        # fused epilogue: out-projection + bias + residual + LayerNorm,
        # so the raw attention output never round-trips through HBM.
        y = bo_ref[...].astype(jnp.float32) + res_ref[0].astype(jnp.float32)
        for h in range(n_heads):
            inv = pl.reciprocal(l_sc[h], approx=True)        # EUP, ~free
            oh = (acc_sc[h] * inv).astype(wo_ref.dtype)      # (tq, dh)
            y = y + jax.lax.dot_general(oh, wo_ref[h], (((1,), (0,)), ((), ())),
                                        preferred_element_type=jnp.float32)
        mu = jnp.mean(y, axis=-1, keepdims=True)
        var = jnp.mean(y * y, axis=-1, keepdims=True) - mu * mu   # one-pass stats
        yn = (y - mu) * jax.lax.rsqrt(var + eps)
        o_ref[0] = (yn * g_ref[...] + be_ref[...]).astype(o_ref.dtype)


def attention_outproj_ln(qkv, key_bias, residual, w_out_h, b_out, gamma, beta, *,
                         n_heads, eps=1e-5, out_dtype=jnp.bfloat16,
                         tq=256, tkv=512):
    """qkv: [3*H, N, S, dh] head-major, key_bias: [N,1,S] f32, residual: [N,S,D].
    Returns LayerNorm(residual + attn @ W_out + b_out) of shape [N, S, D]."""
    _, n, s, dh = qkv.shape
    d = n_heads * dh
    tq = _pick_tile(s, tq, 8)
    tkv = _pick_tile(s, tkv, 128)
    grid = (n, s // tq, s // tkv)
    exp_dtype = jnp.bfloat16 if _has_bf16_eup() else jnp.float32
    # leading block index pins q/k/v (0/1/2) directly in the BlockSpec — no XLA
    # slices of the qkv buffer between pallas_calls.
    q_spec = pl.BlockSpec((n_heads, 1, tq, dh), lambda b, qi, kv: (0, b, qi, 0))
    k_spec = pl.BlockSpec((n_heads, 1, tkv, dh), lambda b, qi, kv: (1, b, kv, 0))
    v_spec = pl.BlockSpec((n_heads, 1, tkv, dh), lambda b, qi, kv: (2, b, kv, 0))
    # TODO(synk): add pipeline_mode=pl.Buffered(3) to k/v specs on v5e if a
    # profile shows exposed KV DMA.
    return pl.pallas_call(
        functools.partial(_attention_kernel, n_heads=n_heads,
                          exp_dtype=exp_dtype, eps=eps),
        out_shape=jax.ShapeDtypeStruct((n, s, d), out_dtype),
        grid=grid,
        in_specs=[q_spec, k_spec, v_spec,
                  pl.BlockSpec((1, 1, tkv), lambda b, qi, kv: (b, 0, kv)),
                  pl.BlockSpec((n_heads, dh, d), lambda b, qi, kv: (0, 0, 0)),
                  pl.BlockSpec((1, d), lambda b, qi, kv: (0, 0)),
                  pl.BlockSpec((1, tq, d), lambda b, qi, kv: (b, qi, 0)),
                  pl.BlockSpec((1, d), lambda b, qi, kv: (0, 0)),
                  pl.BlockSpec((1, d), lambda b, qi, kv: (0, 0))],
        out_specs=pl.BlockSpec((1, tq, d), lambda b, qi, kv: (b, qi, 0)),
        scratch_shapes=[pltpu.VMEM((n_heads, tq, 1), jnp.float32),
                        pltpu.VMEM((n_heads, tq, 1), jnp.float32),
                        pltpu.VMEM((n_heads, tq, dh), jnp.float32)],
        compiler_params=pltpu.CompilerParams(
            dimension_semantics=("parallel", "parallel", "arbitrary"),
            vmem_limit_bytes=_VMEM_LIMIT),
    )(qkv, qkv, qkv, key_bias, w_out_h, b_out.reshape(1, d),
      residual, gamma.reshape(1, d), beta.reshape(1, d))


# ------------------ fused FFN + residual + LayerNorm --------------------------

def _ffn_res_ln_kernel(x_ref, w1_ref, b1_ref, w2_ref, b2_ref, g_ref, be_ref,
                       o_ref, acc_ref, *, eps):
    j = pl.program_id(1)

    @pl.when(j == 0)
    def _():
        acc_ref[...] = jnp.zeros_like(acc_ref)

    # relu(x @ W1_j + b1_j) kept entirely in VMEM, immediately contracted with W2_j
    h = jnp.dot(x_ref[...], w1_ref[...], preferred_element_type=jnp.float32)
    h = jnp.maximum(h + b1_ref[...].astype(jnp.float32), 0.0)
    acc_ref[...] += jnp.dot(h.astype(x_ref.dtype), w2_ref[...],
                            preferred_element_type=jnp.float32)

    @pl.when(j == pl.num_programs(1) - 1)
    def _():
        y = (acc_ref[...] + b2_ref[...].astype(jnp.float32)
             + x_ref[...].astype(jnp.float32))
        mu = jnp.mean(y, axis=-1, keepdims=True)
        var = jnp.mean(y * y, axis=-1, keepdims=True) - mu * mu   # one-pass stats
        yn = (y - mu) * jax.lax.rsqrt(var + eps)
        o_ref[...] = (yn * g_ref[...] + be_ref[...]).astype(o_ref.dtype)


def ffn_residual_layernorm(x, w1, b1, w2, b2, gamma, beta, *, eps=1e-5,
                           out_dtype=jnp.bfloat16, tm=512, th=512):
    m, d = x.shape
    h4 = w1.shape[1]
    tm, m_pad = _choose_m_tile(m, tm)
    th = _pick_tile(h4, th, 128)
    x_p = _pad_rows(x, m_pad)
    grid = (m_pad // tm, h4 // th)
    out = pl.pallas_call(
        functools.partial(_ffn_res_ln_kernel, eps=eps),
        out_shape=jax.ShapeDtypeStruct((m_pad, d), out_dtype),
        grid=grid,
        in_specs=[
            pl.BlockSpec((tm, d), lambda i, j: (i, 0)),
            pl.BlockSpec((d, th), lambda i, j: (0, j)),
            pl.BlockSpec((1, th), lambda i, j: (0, j)),
            pl.BlockSpec((th, d), lambda i, j: (j, 0)),
            pl.BlockSpec((1, d), lambda i, j: (0, 0)),
            pl.BlockSpec((1, d), lambda i, j: (0, 0)),
            pl.BlockSpec((1, d), lambda i, j: (0, 0)),
        ],
        out_specs=pl.BlockSpec((tm, d), lambda i, j: (i, 0)),
        scratch_shapes=[pltpu.VMEM((tm, d), jnp.float32)],
        compiler_params=pltpu.CompilerParams(
            dimension_semantics=("parallel", "arbitrary"),
            vmem_limit_bytes=_VMEM_LIMIT),
    )(x_p, w1, b1.reshape(1, h4), w2, b2.reshape(1, d),
      gamma.reshape(1, d), beta.reshape(1, d))
    return out[:m] if m_pad != m else out


# ----------------------------- plain LayerNorm --------------------------------

def _ln_kernel(x_ref, g_ref, b_ref, o_ref, *, eps):
    x = x_ref[...].astype(jnp.float32)
    mu = jnp.mean(x, axis=-1, keepdims=True)
    var = jnp.mean(x * x, axis=-1, keepdims=True) - mu * mu       # one-pass stats
    yn = (x - mu) * jax.lax.rsqrt(var + eps)
    o_ref[...] = (yn * g_ref[...] + b_ref[...]).astype(o_ref.dtype)


def layernorm(x, gamma, beta, *, eps=1e-5, out_dtype=jnp.float32, tm=512):
    m, d = x.shape
    tm, m_pad = _choose_m_tile(m, tm)
    x_p = _pad_rows(x, m_pad)
    out = pl.pallas_call(
        functools.partial(_ln_kernel, eps=eps),
        out_shape=jax.ShapeDtypeStruct((m_pad, d), out_dtype),
        grid=(m_pad // tm,),
        in_specs=[pl.BlockSpec((tm, d), lambda i: (i, 0)),
                  pl.BlockSpec((1, d), lambda i: (0, 0)),
                  pl.BlockSpec((1, d), lambda i: (0, 0))],
        out_specs=pl.BlockSpec((tm, d), lambda i: (i, 0)),
        compiler_params=pltpu.CompilerParams(
            dimension_semantics=("parallel",), vmem_limit_bytes=_VMEM_LIMIT),
    )(x_p, gamma.reshape(1, d), beta.reshape(1, d))
    return out[:m] if m_pad != m else out


# ----------------------------- parameters ------------------------------------

def init_params(key, n_bands, d_model, n_layers, n_heads, dtype=jnp.bfloat16):
    def dense(k, shape):
        return (0.02 * jax.random.normal(k, shape, jnp.float32)).astype(dtype)

    dh = d_model // n_heads
    scale = 1.0 / math.sqrt(dh)

    keys = jax.random.split(key, 2 + n_layers)
    params = {
        "pos_w": dense(keys[0], (1, d_model)),
        "pos_b": jnp.zeros((d_model,), jnp.float32),
        "band_w": dense(keys[1], (n_bands, d_model)),
        "band_b": jnp.zeros((d_model,), jnp.float32),
        "final_g": jnp.ones((d_model,), jnp.float32),
        "final_b": jnp.zeros((d_model,), jnp.float32),
        "layers": [],
    }
    for l in range(n_layers):
        lk = jax.random.split(keys[2 + l], 4)
        w_qkv = dense(lk[0], (3, d_model, d_model))        # stacked [Wq, Wk, Wv]
        b_qkv = jnp.zeros((3, d_model), jnp.float32)
        # fold the softmax 1/sqrt(dh) scale into the Q projection at param-prep
        # time: removes the per-score VPU multiply from the flash inner loop.
        w_qkv = w_qkv.at[0].set(
            (w_qkv[0].astype(jnp.float32) * scale).astype(dtype))
        b_qkv = b_qkv.at[0].set(b_qkv[0] * scale)
        params["layers"].append(dict(
            w_qkv=w_qkv,
            b_qkv=b_qkv,
            w_out=dense(lk[1], (d_model, d_model)),
            b_out=jnp.zeros((d_model,), jnp.float32),
            ln1_g=jnp.ones((d_model,), jnp.float32),
            ln1_b=jnp.zeros((d_model,), jnp.float32),
            w_ff1=dense(lk[2], (d_model, 4 * d_model)),
            b_ff1=jnp.zeros((4 * d_model,), jnp.float32),
            w_ff2=dense(lk[3], (4 * d_model, d_model)),
            b_ff2=jnp.zeros((d_model,), jnp.float32),
            ln2_g=jnp.ones((d_model,), jnp.float32),
            ln2_b=jnp.zeros((d_model,), jnp.float32),
        ))
    return params


# ----------------------------- forward ----------------------------------------

def transformer_encoder_forward(params, ts, positions, mask, *, n_heads):
    """ts: [N,S,B] float, positions: [N,S] float, mask: [N,S] (1 == valid)."""
    n, s, b = ts.shape
    d = params["band_w"].shape[1]
    dh = d // n_heads

    # Fused position + bands embedding: one GEMM on [pos | bands].
    emb_in = jnp.concatenate(
        [positions[..., None].astype(jnp.float32), ts.astype(jnp.float32)],
        axis=-1).reshape(n * s, 1 + b).astype(jnp.bfloat16)
    emb_w = jnp.concatenate([params["pos_w"], params["band_w"]], axis=0)
    emb_b = params["pos_b"] + params["band_b"]
    # TODO(synk): dropout layers are identity at inference time and are omitted.
    x = matmul_bias(emb_in, emb_w, emb_b, out_dtype=jnp.bfloat16)     # [N*S, D]

    # mask == 0 -> invalid key (reference does `mask = mask == 0`). f32 bias,
    # shaped [N,1,S] so it broadcasts over heads inside the kernel.
    key_bias = jnp.where(mask == 0, -1e30, 0.0).astype(jnp.float32).reshape(n, 1, s)

    # nn.TransformerEncoderLayer defaults: post-norm, ReLU FFN, eps=1e-5.
    for lp in params["layers"]:
        qkv = qkv_projection(x, lp["w_qkv"], lp["b_qkv"],
                             n_heads=n_heads)                         # [3,H,M,dh]
        qkv = qkv.reshape(3 * n_heads, n, s, dh)                      # free reshape
        # fused: norm1(x + attn @ W_out + b_out); no [M,D] HBM round trip.
        x = attention_outproj_ln(
            qkv, key_bias, x.reshape(n, s, d),
            lp["w_out"].reshape(n_heads, dh, d), lp["b_out"],
            lp["ln1_g"], lp["ln1_b"], n_heads=n_heads)                # [N,S,D]
        x = x.reshape(n * s, d)
        # fused: norm2(x + relu(x@W1+b1)@W2 + b2), 4D intermediate stays in VMEM.
        x = ffn_residual_layernorm(x, lp["w_ff1"], lp["b_ff1"],
                                   lp["w_ff2"], lp["b_ff2"],
                                   lp["ln2_g"], lp["ln2_b"])

    # Final encoder_norm (LayerNorm) of nn.TransformerEncoder.
    x = layernorm(x, params["final_g"], params["final_b"], out_dtype=jnp.float32)
    return x.reshape(n, s, d)


# ----------------------------- main --------------------------------------------

if __name__ == "__main__":
    N, S, B = 2, 8, 4
    D_MODEL, N_HEADS, N_LAYERS = 32, 4, 2

    key = jax.random.PRNGKey(0)
    k_ts, k_params = jax.random.split(key, 2)
    ts = jax.random.normal(k_ts, (N, S, B), jnp.float32)
    positions = jnp.tile(jnp.arange(S, dtype=jnp.float32)[None, :], (N, 1))
    mask = jnp.ones((N, S), jnp.int32).at[:, -2:].set(0)   # last 2 steps padded

    params = init_params(k_params, B, D_MODEL, N_LAYERS, N_HEADS)
    out = transformer_encoder_forward(params, ts, positions, mask, n_heads=N_HEADS)
    out = jax.block_until_ready(out)
    assert out.shape == (N, S, D_MODEL)
    assert bool(jnp.all(jnp.isfinite(out)))
    print("KERNEL_OK")
</pallas_src>

<mosaic_0001>
module attributes {stable_mosaic.version = 11 : i64} {
  func.func @_matmul_bias_kernel(%arg0: i32, %arg1: i32, %arg2: i32, %arg3: memref<16x5xbf16, #tpu.memory_space<vmem>>, %arg4: memref<5x32xbf16, #tpu.memory_space<vmem>>, %arg5: memref<1x32xf32, #tpu.memory_space<vmem>>, %arg6: memref<16x32xbf16, #tpu.memory_space<vmem>>, %arg7: memref<16x32xf32, #tpu.memory_space<vmem>>) attributes {dimension_semantics = [#tpu.dimension_semantics<parallel>, #tpu.dimension_semantics<parallel>, #tpu.dimension_semantics<arbitrary>], iteration_bounds = array<i64: 1, 1, 1>, scalar_prefetch = 0 : i64, scratch_operands = 1 : i64, tpu.core_type = #tpu.core_type<tc>, window_params = [{transform_indices = @transform_0, window_bounds = array<i64: 16, 5>}, {transform_indices = @transform_1, window_bounds = array<i64: 5, 32>}, {transform_indices = @transform_2, window_bounds = array<i64: 1, 32>}, {transform_indices = @transform_3, window_bounds = array<i64: 16, 32>}]} {
    %c0_i32 = arith.constant 0 : i32
    %0 = arith.cmpi eq, %arg2, %c0_i32 : i32
    %1 = arith.extui %0 : i1 to i32
    %c0_i32_0 = arith.constant 0 : i32
    %2 = arith.cmpi ne, %1, %c0_i32_0 : i32
    scf.if %2 {
      %cst_10 = arith.constant 0.000000e+00 : f32
      %12 = vector.broadcast %cst_10 : f32 to vector<16x32xf32>
      %c0_11 = arith.constant 0 : index
      %c0_12 = arith.constant 0 : index
      %13 = vector.load %arg7[%c0_11, %c0_12] : memref<16x32xf32, #tpu.memory_space<vmem>>, vector<16x32xf32>
      tpu.vector_store %arg7[%c0_11, %c0_12], %12 {strides = array<i32>} : memref<16x32xf32, #tpu.memory_space<vmem>>, vector<16x32xf32>,
    } else {
    }
    %c0 = arith.constant 0 : index
    %c0_1 = arith.constant 0 : index
    %3 = vector.load %arg7[%c0, %c0_1] : memref<16x32xf32, #tpu.memory_space<vmem>>, vector<16x32xf32>
    %c0_2 = arith.constant 0 : index
    %c0_3 = arith.constant 0 : index
    %4 = vector.load %arg3[%c0_2, %c0_3] : memref<16x5xbf16, #tpu.memory_space<vmem>>, vector<16x5xbf16>
    %c0_4 = arith.constant 0 : index
    %c0_5 = arith.constant 0 : index
    %5 = vector.load %arg4[%c0_4, %c0_5] : memref<5x32xbf16, #tpu.memory_space<vmem>>, vector<5x32xbf16>
    %cst = arith.constant dense<0.000000e+00> : vector<16x32xf32>
    %6 = tpu.matmul %4, %5, %cst {dimension_numbers = #tpu.dot_dimension_numbers<[1], [0], [0], [1], [0, 0, 1, 1], [], []>} : vector<16x5xbf16>, vector<5x32xbf16>, vector<16x32xf32> -> vector<16x32xf32>
    %7 = arith.addf %3, %6 : vector<16x32xf32>
    %c0_6 = arith.constant 0 : index
    %c0_7 = arith.constant 0 : index
    %8 = vector.load %arg7[%c0_6, %c0_7] : memref<16x32xf32, #tpu.memory_space<vmem>>, vector<16x32xf32>
    tpu.vector_store %arg7[%c0_6, %c0_7], %7 {strides = array<i32>} : memref<16x32xf32, #tpu.memory_space<vmem>>, vector<16x32xf32>,
    %c0_i32_8 = arith.constant 0 : i32
    %9 = arith.cmpi eq, %arg2, %c0_i32_8 : i32
    %10 = arith.extui %9 : i1 to i32
    %c0_i32_9 = arith.constant 0 : i32
    %11 = arith.cmpi ne, %10, %c0_i32_9 : i32
    scf.if %11 {
      %c0_10 = arith.constant 0 : index
      %c0_11 = arith.constant 0 : index
      %12 = vector.load %arg7[%c0_10, %c0_11] : memref<16x32xf32, #tpu.memory_space<vmem>>, vector<16x32xf32>
      %c0_12 = arith.constant 0 : index
      %c0_13 = arith.constant 0 : index
      %13 = vector.load %arg5[%c0_12, %c0_13] : memref<1x32xf32, #tpu.memory_space<vmem>>, vector<1x32xf32>
      %14 = vector.broadcast %13 : vector<1x32xf32> to vector<16x32xf32>
      %15 = arith.addf %12, %14 : vector<16x32xf32>
      %16 = arith.truncf %15 : vector<16x32xf32> to vector<16x32xbf16>
      %c0_14 = arith.constant 0 : index
      %c0_15 = arith.constant 0 : index
      %17 = vector.load %arg6[%c0_14, %c0_15] : memref<16x32xbf16, #tpu.memory_space<vmem>>, vector<16x32xbf16>
      tpu.vector_store %arg6[%c0_14, %c0_15], %16 {strides = array<i32>} : memref<16x32xbf16, #tpu.memory_space<vmem>>, vector<16x32xbf16>,
    } else {
    }
    return
  }
  func.func @transform_0(%arg0: i32, %arg1: i32, %arg2: i32) -> (i32, i32) {
    %c0_i32 = arith.constant 0 : i32
    return %arg0, %arg2 : i32, i32
  }
  func.func @transform_1(%arg0: i32, %arg1: i32, %arg2: i32) -> (i32, i32) {
    %c0_i32 = arith.constant 0 : i32
    return %arg2, %arg1 : i32, i32
  }
  func.func @transform_2(%arg0: i32, %arg1: i32, %arg2: i32) -> (i32, i32) {
    %c0_i32 = arith.constant 0 : i32
    %c0_i32_0 = arith.constant 0 : i32
    return %c0_i32, %arg1 : i32, i32
  }
  func.func @transform_3(%arg0: i32, %arg1: i32, %arg2: i32) -> (i32, i32) {
    %c0_i32 = arith.constant 0 : i32
    return %arg0, %arg1 : i32, i32
  }
}

</mosaic_0001>

<bundles_post_ra>
// kernel: tpu_custom_call.1
= control target key start
LH: loop header
LB: loop body
LE: loop exit
PB: predicated region body
PF: predicated region fallthrough
CT: control target
= control target key end

     0   :  { %vm20_vm0 = vcmask 261120   ;;  %vm37_vm1 = vcmask 1041408   ;;  %vm38_vm2 = vcmask 1042432   ;;  %v177_v1 = vmov 0.0   ;;  %s228_s0 = inlined_call_operand.vmem [shape: bf16[16,5], index: 0, kind: input, shape index: {}]   ;;  %s229_s1 = inlined_call_operand.vmem [shape: bf16[5,32], index: 1, kind: input, shape index: {}]   ;;  %s230_s2 = inlined_call_operand.vmem [shape: f32[1,32], index: 2, kind: input, shape index: {}]   ;;  %s231_s3 = inlined_call_operand.hbm [shape: bf16[16,32], index: 3, kind: output, shape index: {}]  }
   0x1   :  { %v27_v0 = vld [vmem:[%s229_s1] sm:$0x7]  ;;  %21 = vst.msk [vmem:[#allocation2] sm:$0xff] %vm20_vm0, %v177_v1  ;;  %22 = vst.msk [vmem:[#allocation2 + $0x8] sm:$0xff] %vm20_vm0, %v177_v1  ;;  %140 = vmatprep.subr.bf16.mxu0 %v177_v1  ;;  %v178_v2 = vmov 65535   ;;  %vm179_vm3 = vmmov 0  }
   0x2   :  { %v39_v3 = vsel %vm37_vm1, 4294967295, %v178_v2  ;;  %142 = vmatprep.mubr.msk.bf16.mxu0 %vm179_vm3, %v177_v1 }
   0x3   :  { %8 = vsyncpa [#allocation4], 0  ;;  %v40_v4 = vsel %vm38_vm2, %v39_v3, 0  ;;  %v152_v6 = vld [vmem:[%s228_s0] sm:$0xff]   ;;  %vm33_vm4 = vcmask 39936   ;;  %s180_s0 = smov [#allocation3]  }
   0x4   :  { %v42_v5 = vand.u32 %v40_v4, %v27_v0  ;;  %v133_v15 = vld [vmem:[%s230_s2] ss:$0 sm:$0xff]  ;;  %s120_s17 = sshll.u32 %s180_s0, 4  ;;  %vm112_vm5 = vcmask 257024   ;;  %s121_s17 = int_to_ptr.vmem [resolvable:$true] %s120_s17 }
   0x5   :  { %s153_s18 = scalar_lea.vmem %s121_s17, 128  ;;  %p158_p1 = scmp.lt.s32.totalorder %s121_s17, %s121_s17 }
   0x6   :  { %141 = vmatpush3.bf16.msra.mxu0 %v42_v5  ;;  %p154_p0 = scmp.ne.s32.totalorder %s121_s17, %s153_s18  ;;  %p159_p2 = scmp.lt.s32.totalorder %s153_s18, %s153_s18 }
   0x8   :  { %v23_v7 = vld [vmem:[#allocation2] sm:$0xff]  ;;  %v24_v9 = vld [vmem:[#allocation2 + $0x8] sm:$0xff]  ;;  %p160_p3 = por %p159_p2, %p158_p1 }
   0x9   :  { %143 = vmatmul.mubr.msk.bf16.vlgmr.msra.gmra.mrb[0].mxu0 %vm33_vm4, %v152_v6 }
   0xa   :  { %p161_p4 = pnand %p160_p3, %p154_p0 }
  0xdc   :  { %v78_v8 = vpop.f32.mrb[0].mxu0 }
  0xdd   :  { %v85_v10 = vadd.f32 %v78_v8, %v23_v7  ;;  %v144_v11 = vpop.f32.mrb[1].mxu0 }
  0xde   :  { %v81_v12 = vpop.f32.mrb[2].mxu0 }
  0xdf   :  { %88 = vst.msk [vmem:[#allocation2] sm:$0xff] %vm20_vm0, %v85_v10  ;;  %v86_v13 = vadd.f32 %v81_v12, %v24_v9  ;;  %v145_v14 = vpop.f32.mrb[3].mxu0 }
  0xe1   :  { %89 = vst.msk [vmem:[#allocation2 + $0x8] sm:$0xff] %vm20_vm0, %v86_v13 }
  0xe6   :  { %v93_v16 = vld [vmem:[#allocation2] sm:$0xff] }
  0xe7   :  { %v102_v17 = vadd.f32 %v133_v15, %v93_v16 }
  0xe8   :  { %v94_v18 = vld [vmem:[#allocation2 + $0x8] sm:$0xff] }
  0xe9   :  { %v103_v19 = vadd.f32 %v133_v15, %v94_v18  ;;  %v136_v20 = vpack.c.bf16 %v102_v17, %v102_v17 }
  0xeb   :  { %v137_v21 = vpack.c.bf16 %v103_v19, %v103_v19  ;;  %113 = vst.msk [vmem:[#allocation3] sm:$0xf] %vm112_vm5, %v136_v20 }
  0xed   :  { %114 = vst.msk [vmem:[#allocation3 + $0x4] sm:$0xf] %vm112_vm5, %v137_v21 }
  0xee   :  { %164 = shalt.err (!%p161_p4)
}
  0xef   :  { %s165_s20 = scalar_lea.hbm %s231_s3, 128 }
  0xf0   :  { %p166_p5 = scmp.ne.s32.totalorder %s231_s3, %s165_s20  ;;  %p169_p6 = scmp.lt.u32.totalorder %s165_s20, %s231_s3 }
  0xf2   :  { %p171_p7 = pnand %p169_p6, %p166_p5 }
  0xf4   :  { %174 = shalt.err (!%p171_p7)
}
  0xf5   :  { %s181_s25 = smov 64   ;;  %s182_s26 = smov 4  }
  0xf6   :  { %126 = dma.vmem_to_hbm [thread:$0]  %s121_s17, 128, %s231_s3, [#allocation4], %s181_s25, %s181_s25, %s182_s26  }
  0xf7   :  { %175 = dma.done.wait [#allocation4], 128  }
  0xf8   :  { %176 = vsyncadd [#allocation4], 4294967168 }
  0xf9   :  { %130 = vsyncpa [#allocation4], 1 }

</bundles_post_ra>
